<compile_context>
chip_gen: v7x
topology: tpu7x:2x2x1
jax: 0.10.0
libtpu: 0.0.40
codegen_flags: <defaults>
</compile_context>

<pallas_src>
import functools
import math

import jax
import jax.numpy as jnp
from jax import lax
from jax.experimental import pallas as pl
from jax.experimental.pallas import tpu as pltpu


_LANE = 128                                 # lanes per vreg row
_SUBLANE32 = 8                              # sublanes per vreg for 32-bit dtypes
_MAX_UNROLL = 64                            # cap on in-body copy unrolling (G * L)
_SPLIT_THRESHOLD_BYTES = 2 * 1024 * 1024    # above this, force >= 2 grid steps (v7x megacore)


def _round_up(x, m):
    return -(-x // m) * m


def _vmem_capacity_bytes():
    """Physical VMEM per TensorCore (128 MiB v5e/v6e, 64 MiB v7x)."""
    try:
        cap = getattr(pltpu.get_tpu_info(), "vmem_capacity_bytes", None)
        if cap:
            return int(cap)
    except Exception:
        pass
    return 64 * 1024 * 1024                 # conservative (v7x-sized) default


def _padded_block_bytes(block_shape, dtype):
    """VMEM bytes of one block including (sublane, lane) tiling padding."""
    itemsize = jnp.dtype(dtype).itemsize
    shape = list(block_shape)
    if len(shape) >= 1:
        shape[-1] = _round_up(shape[-1], _LANE)
    if len(shape) >= 2:
        sublane = _SUBLANE32 * max(1, 4 // itemsize)   # bf16 -> 16, int8 -> 32
        shape[-2] = _round_up(shape[-2], sublane)
    return math.prod(shape) * itemsize


def _choose_leading_block(P, bytes_per_p, budget):
    """Largest leading-axis block within the padded VMEM budget.

    Ragged last blocks are handled by Pallas masking, so no divisibility
    shrinking.  Large copies get >= 2 grid steps so both v7x TensorCores are
    used (no effect on v5e/v6e: 1 TC, and the extra ~0.35us step is noise at
    that size).
    """
    p_blk = max(1, min(P, budget // max(1, bytes_per_p)))
    if P >= 2 and P * bytes_per_p > _SPLIT_THRESHOLD_BYTES:
        p_blk = min(p_blk, -(-P // 2))
    return p_blk


def _lane_packed_copy_kernel(L, G, Tc, x_ref, o_ref):
    """Swap adjacent dims (L, N) with an untouched trailing block Tc.

    x_ref: (p_blk, L, N2, G*Tc)   input view, N split as n = n2*G + g
    o_ref: (p_blk, N2, G*L*Tc)    lane-dense output slab
    out[p, n2, (g*L + l)*Tc + t] = x[p, l, n2, g*Tc + t]
    Pure sub-slice copies: no concatenate temporary, no in-kernel swapaxes.
    """
    for g in range(G):
        for l in range(L):
            o_ref[:, :, (g * L + l) * Tc:(g * L + l + 1) * Tc] = (
                x_ref[:, l, :, g * Tc:(g + 1) * Tc])


def _swapaxes_block_kernel(ax1, ax2, x_ref, o_ref):
    """Generic fallback: block resident in VMEM, on-chip axis swap."""
    o_ref[...] = jnp.swapaxes(x_ref[...], ax1, ax2)


def transpose_pallas(x, dim1, dim2):
    """Pallas equivalent of torch.Tensor.transpose(dim1, dim2)."""
    ndim = x.ndim
    dim1 %= ndim
    dim2 %= ndim
    if dim1 == dim2:
        return x
    lo, hi = sorted((dim1, dim2))

    out_shape = list(x.shape)
    out_shape[lo], out_shape[hi] = out_shape[hi], out_shape[lo]
    out_shape = tuple(out_shape)

    vmem_cap = _vmem_capacity_bytes()
    block_budget = vmem_cap // 8        # in+out per block; x2 double buffering -> cap/4
    vmem_limit = vmem_cap // 2

    # ------------------------------------------------------------------
    # Fast path: swapped dims are adjacent, the lane (last) dim is untouched,
    # and the in-body unroll stays small.  Permutation becomes G*L sub-slice
    # copies into a lane-dense (multiple-of-128) output slab.
    # ------------------------------------------------------------------
    if hi == lo + 1 and hi < ndim - 1 and x.shape[lo] <= _MAX_UNROLL:
        P = math.prod(x.shape[:lo])
        L = x.shape[lo]
        N = x.shape[hi]
        T = math.prod(x.shape[hi + 1:])

        orig_dtype = x.dtype
        itemsize = jnp.dtype(orig_dtype).itemsize

        # Optional sub-32-bit packing along the untouched trailing dim.
        k = 1
        work = x.reshape(P, L, N, T)
        if itemsize < 4 and orig_dtype != jnp.dtype(bool) and (T * itemsize) % 4 == 0:
            k = 4 // itemsize
            work = lax.bitcast_convert_type(
                work.reshape(P, L, N, T // k, k), jnp.uint32)
        Tc = T // k
        work_dtype = work.dtype

        # Lane-density grouping: pack G rows of N so the stored lane width
        # G*L*Tc is a multiple of 128 (unmasked vst, dense writeback DMA).
        base = L * Tc
        g0 = _LANE // math.gcd(base, _LANE)
        G = 1
        if base % _LANE != 0 and N % g0 == 0 and g0 * L <= _MAX_UNROLL:
            G = g0
        N2 = N // G

        x_in = work.reshape(P, L, N2, G * Tc)      # pure reshape (free relabel)

        in_bpp = _padded_block_bytes((1, L, N2, G * Tc), work_dtype)
        out_bpp = _padded_block_bytes((1, N2, G * L * Tc), work_dtype)
        p_blk = _choose_leading_block(P, in_bpp + out_bpp, block_budget)
        grid = (pl.cdiv(P, p_blk),)                # == (1,) for the test shape

        out_flat = pl.pallas_call(
            functools.partial(_lane_packed_copy_kernel, L, G, Tc),
            out_shape=jax.ShapeDtypeStruct((P, N2, G * L * Tc), work_dtype),
            grid=grid,
            in_specs=[pl.BlockSpec((p_blk, L, N2, G * Tc),
                                   lambda p: (p, 0, 0, 0))],
            out_specs=pl.BlockSpec((p_blk, N2, G * L * Tc),
                                   lambda p: (p, 0, 0)),
            compiler_params=pltpu.CompilerParams(
                dimension_semantics=("parallel",),
                vmem_limit_bytes=vmem_limit),
        )(x_in)

        # Un-merge the lane packing outside the kernel: (G, L, Tc) lane split,
        # then (N2, G) -> N merge; both are order-preserving reshapes.
        res = out_flat.reshape(P, N2, G, L, Tc).reshape(P, N, L, Tc)
        if k > 1:
            res = lax.bitcast_convert_type(res, orig_dtype).reshape(P, N, L, T)
        return res.reshape(out_shape)

    # ------------------------------------------------------------------
    # Generic path (non-adjacent dims, lane dim swapped, or large L): tile over
    # the untouched leading dims, on-chip swapaxes per block.
    # TODO(synk): when lo == 0 and the array exceeds the VMEM budget, also tile
    # an untouched trailing axis; currently that case is a single block.
    # ------------------------------------------------------------------
    P = math.prod(x.shape[:lo])                    # == 1 when lo == 0
    rest = tuple(x.shape[lo:])
    rest_out = list(rest)
    rest_out[0], rest_out[hi - lo] = rest_out[hi - lo], rest_out[0]
    rest_out = tuple(rest_out)
    a1, a2 = 1, 1 + (hi - lo)
    n_rest = len(rest)

    x_c = x.reshape((P,) + rest)
    in_bpp = _padded_block_bytes((1,) + rest, x.dtype)
    out_bpp = _padded_block_bytes((1,) + rest_out, x.dtype)
    p_blk = _choose_leading_block(P, in_bpp + out_bpp, block_budget)
    grid = (pl.cdiv(P, p_blk),)

    out_flat = pl.pallas_call(
        functools.partial(_swapaxes_block_kernel, a1, a2),
        out_shape=jax.ShapeDtypeStruct((P,) + rest_out, x.dtype),
        grid=grid,
        in_specs=[pl.BlockSpec((p_blk,) + rest,
                               lambda p: (p,) + (0,) * n_rest)],
        out_specs=pl.BlockSpec((p_blk,) + rest_out,
                               lambda p: (p,) + (0,) * n_rest),
        compiler_params=pltpu.CompilerParams(
            dimension_semantics=("parallel",),
            vmem_limit_bytes=vmem_limit),
    )(x_c)
    return out_flat.reshape(out_shape)


class TransposePallas:
    """Mirror of the PyTorch module: Transpose(dim1, dim2)."""

    def __init__(self, dim1, dim2):
        self.dim1 = dim1
        self.dim2 = dim2

    def __call__(self, x):
        return transpose_pallas(x, self.dim1, self.dim2)


if __name__ == "__main__":
    key = jax.random.PRNGKey(0)
    # Small NCHW input consistent with typical use of Transpose in conv models.
    x = jax.random.normal(key, (2, 4, 16, 16), dtype=jnp.float32)

    module = TransposePallas(dim1=1, dim2=2)       # x.transpose(1, 2)
    out = jax.block_until_ready(module(x))

    # Reference check against plain JAX swapaxes (== torch .transpose(1, 2)).
    ref = jnp.swapaxes(x, 1, 2)
    assert out.shape == (2, 16, 4, 16), out.shape
    assert out.dtype == x.dtype
    assert jnp.array_equal(out, ref), "Pallas transpose mismatch"

    print("KERNEL_OK")
</pallas_src>

<mosaic_0001>
module attributes {stable_mosaic.version = 11 : i64} {
  func.func @_lane_packed_copy_kernel(%arg0: i32, %arg1: memref<2x4x8x32xf32, #tpu.memory_space<vmem>>, %arg2: memref<2x8x128xf32, #tpu.memory_space<vmem>>) attributes {dimension_semantics = [#tpu.dimension_semantics<parallel>], iteration_bounds = array<i64: 1>, scalar_prefetch = 0 : i64, scratch_operands = 0 : i64, tpu.core_type = #tpu.core_type<tc>, window_params = [{transform_indices = @transform_0, window_bounds = array<i64: 2, 4, 8, 32>}, {transform_indices = @transform_1, window_bounds = array<i64: 2, 8, 128>}]} {
    %c0 = arith.constant 0 : index
    %c0_0 = arith.constant 0 : index
    %c0_1 = arith.constant 0 : index
    %c0_2 = arith.constant 0 : index
    %0 = vector.load %arg1[%c0, %c0_0, %c0_1, %c0_2] : memref<2x4x8x32xf32, #tpu.memory_space<vmem>>, vector<2x1x8x16xf32>
    %1 = vector.shape_cast %0 : vector<2x1x8x16xf32> to vector<2x8x16xf32>
    %c0_3 = arith.constant 0 : index
    %c0_4 = arith.constant 0 : index
    %c0_5 = arith.constant 0 : index
    %2 = vector.load %arg2[%c0_3, %c0_4, %c0_5] : memref<2x8x128xf32, #tpu.memory_space<vmem>>, vector<2x8x16xf32>
    tpu.vector_store %arg2[%c0_3, %c0_4, %c0_5], %1 {strides = array<i32>} : memref<2x8x128xf32, #tpu.memory_space<vmem>>, vector<2x8x16xf32>,
    %c0_6 = arith.constant 0 : index
    %c1 = arith.constant 1 : index
    %c0_7 = arith.constant 0 : index
    %c0_8 = arith.constant 0 : index
    %3 = vector.load %arg1[%c0_6, %c1, %c0_7, %c0_8] : memref<2x4x8x32xf32, #tpu.memory_space<vmem>>, vector<2x1x8x16xf32>
    %4 = vector.shape_cast %3 : vector<2x1x8x16xf32> to vector<2x8x16xf32>
    %c0_9 = arith.constant 0 : index
    %c0_10 = arith.constant 0 : index
    %c16 = arith.constant 16 : index
    %5 = vector.load %arg2[%c0_9, %c0_10, %c16] : memref<2x8x128xf32, #tpu.memory_space<vmem>>, vector<2x8x16xf32>
    tpu.vector_store %arg2[%c0_9, %c0_10, %c16], %4 {strides = array<i32>} : memref<2x8x128xf32, #tpu.memory_space<vmem>>, vector<2x8x16xf32>,
    %c0_11 = arith.constant 0 : index
    %c2 = arith.constant 2 : index
    %c0_12 = arith.constant 0 : index
    %c0_13 = arith.constant 0 : index
    %6 = vector.load %arg1[%c0_11, %c2, %c0_12, %c0_13] : memref<2x4x8x32xf32, #tpu.memory_space<vmem>>, vector<2x1x8x16xf32>
    %7 = vector.shape_cast %6 : vector<2x1x8x16xf32> to vector<2x8x16xf32>
    %c0_14 = arith.constant 0 : index
    %c0_15 = arith.constant 0 : index
    %c32 = arith.constant 32 : index
    %8 = vector.load %arg2[%c0_14, %c0_15, %c32] : memref<2x8x128xf32, #tpu.memory_space<vmem>>, vector<2x8x16xf32>
    tpu.vector_store %arg2[%c0_14, %c0_15, %c32], %7 {strides = array<i32>} : memref<2x8x128xf32, #tpu.memory_space<vmem>>, vector<2x8x16xf32>,
    %c0_16 = arith.constant 0 : index
    %c3 = arith.constant 3 : index
    %c0_17 = arith.constant 0 : index
    %c0_18 = arith.constant 0 : index
    %9 = vector.load %arg1[%c0_16, %c3, %c0_17, %c0_18] : memref<2x4x8x32xf32, #tpu.memory_space<vmem>>, vector<2x1x8x16xf32>
    %10 = vector.shape_cast %9 : vector<2x1x8x16xf32> to vector<2x8x16xf32>
    %c0_19 = arith.constant 0 : index
    %c0_20 = arith.constant 0 : index
    %c48 = arith.constant 48 : index
    %11 = vector.load %arg2[%c0_19, %c0_20, %c48] : memref<2x8x128xf32, #tpu.memory_space<vmem>>, vector<2x8x16xf32>
    tpu.vector_store %arg2[%c0_19, %c0_20, %c48], %10 {strides = array<i32>} : memref<2x8x128xf32, #tpu.memory_space<vmem>>, vector<2x8x16xf32>,
    %c0_21 = arith.constant 0 : index
    %c0_22 = arith.constant 0 : index
    %c0_23 = arith.constant 0 : index
    %c16_24 = arith.constant 16 : index
    %12 = vector.load %arg1[%c0_21, %c0_22, %c0_23, %c16_24] : memref<2x4x8x32xf32, #tpu.memory_space<vmem>>, vector<2x1x8x16xf32>
    %13 = vector.shape_cast %12 : vector<2x1x8x16xf32> to vector<2x8x16xf32>
    %c0_25 = arith.constant 0 : index
    %c0_26 = arith.constant 0 : index
    %c64 = arith.constant 64 : index
    %14 = vector.load %arg2[%c0_25, %c0_26, %c64] : memref<2x8x128xf32, #tpu.memory_space<vmem>>, vector<2x8x16xf32>
    tpu.vector_store %arg2[%c0_25, %c0_26, %c64], %13 {strides = array<i32>} : memref<2x8x128xf32, #tpu.memory_space<vmem>>, vector<2x8x16xf32>,
    %c0_27 = arith.constant 0 : index
    %c1_28 = arith.constant 1 : index
    %c0_29 = arith.constant 0 : index
    %c16_30 = arith.constant 16 : index
    %15 = vector.load %arg1[%c0_27, %c1_28, %c0_29, %c16_30] : memref<2x4x8x32xf32, #tpu.memory_space<vmem>>, vector<2x1x8x16xf32>
    %16 = vector.shape_cast %15 : vector<2x1x8x16xf32> to vector<2x8x16xf32>
    %c0_31 = arith.constant 0 : index
    %c0_32 = arith.constant 0 : index
    %c80 = arith.constant 80 : index
    %17 = vector.load %arg2[%c0_31, %c0_32, %c80] : memref<2x8x128xf32, #tpu.memory_space<vmem>>, vector<2x8x16xf32>
    tpu.vector_store %arg2[%c0_31, %c0_32, %c80], %16 {strides = array<i32>} : memref<2x8x128xf32, #tpu.memory_space<vmem>>, vector<2x8x16xf32>,
    %c0_33 = arith.constant 0 : index
    %c2_34 = arith.constant 2 : index
    %c0_35 = arith.constant 0 : index
    %c16_36 = arith.constant 16 : index
    %18 = vector.load %arg1[%c0_33, %c2_34, %c0_35, %c16_36] : memref<2x4x8x32xf32, #tpu.memory_space<vmem>>, vector<2x1x8x16xf32>
    %19 = vector.shape_cast %18 : vector<2x1x8x16xf32> to vector<2x8x16xf32>
    %c0_37 = arith.constant 0 : index
    %c0_38 = arith.constant 0 : index
    %c96 = arith.constant 96 : index
    %20 = vector.load %arg2[%c0_37, %c0_38, %c96] : memref<2x8x128xf32, #tpu.memory_space<vmem>>, vector<2x8x16xf32>
    tpu.vector_store %arg2[%c0_37, %c0_38, %c96], %19 {strides = array<i32>} : memref<2x8x128xf32, #tpu.memory_space<vmem>>, vector<2x8x16xf32>,
    %c0_39 = arith.constant 0 : index
    %c3_40 = arith.constant 3 : index
    %c0_41 = arith.constant 0 : index
    %c16_42 = arith.constant 16 : index
    %21 = vector.load %arg1[%c0_39, %c3_40, %c0_41, %c16_42] : memref<2x4x8x32xf32, #tpu.memory_space<vmem>>, vector<2x1x8x16xf32>
    %22 = vector.shape_cast %21 : vector<2x1x8x16xf32> to vector<2x8x16xf32>
    %c0_43 = arith.constant 0 : index
    %c0_44 = arith.constant 0 : index
    %c112 = arith.constant 112 : index
    %23 = vector.load %arg2[%c0_43, %c0_44, %c112] : memref<2x8x128xf32, #tpu.memory_space<vmem>>, vector<2x8x16xf32>
    tpu.vector_store %arg2[%c0_43, %c0_44, %c112], %22 {strides = array<i32>} : memref<2x8x128xf32, #tpu.memory_space<vmem>>, vector<2x8x16xf32>,
    return
  }
  func.func @transform_0(%arg0: i32) -> (i32, i32, i32, i32) {
    %c0_i32 = arith.constant 0 : i32
    %c0_i32_0 = arith.constant 0 : i32
    %c0_i32_1 = arith.constant 0 : i32
    %c0_i32_2 = arith.constant 0 : i32
    return %arg0, %c0_i32, %c0_i32_0, %c0_i32_1 : i32, i32, i32, i32
  }
  func.func @transform_1(%arg0: i32) -> (i32, i32, i32) {
    %c0_i32 = arith.constant 0 : i32
    %c0_i32_0 = arith.constant 0 : i32
    %c0_i32_1 = arith.constant 0 : i32
    return %arg0, %c0_i32, %c0_i32_0 : i32, i32, i32
  }
}

</mosaic_0001>

<bundles_post_ra>
// kernel: tpu_custom_call.1
= control target key start
LH: loop header
LB: loop body
LE: loop exit
PB: predicated region body
PF: predicated region fallthrough
CT: control target
= control target key end

     0   :  { %6 = vsyncpa [#allocation3], 0  ;;  %s247_s0 = inlined_call_operand.hbm [shape: f32[2,4,8,32], index: 0, kind: input, shape index: {}]   ;;  %s248_s1 = inlined_call_operand.hbm [shape: f32[2,8,128], index: 1, kind: output, shape index: {}]  }
   0x1   :  { %7 = vsyncpa [#allocation4], 0  ;;  %s197_s6 = smov [#allocation2]   ;;  %s149_s10 = scalar_lea.hbm %s247_s0, 1024 }
   0x2   :  { %s13_s7 = sshll.u32 %s197_s6, 4  ;;  %p150_p0 = scmp.ne.s32.totalorder %s247_s0, %s149_s10  ;;  %s14_s7 = int_to_ptr.vmem [resolvable:$true] %s13_s7 }
   0x3   :  { %p153_p1 = scmp.lt.u32.totalorder %s149_s10, %s247_s0 }
   0x5   :  { %p155_p2 = pnand %p153_p1, %p150_p0 }
   0x7   :  { %158 = shalt.err (!%p155_p2)
}
   0x8   :  { %s159_s15 = scalar_lea.vmem %s14_s7, 1024  ;;  %p164_p4 = scmp.lt.s32.totalorder %s14_s7, %s14_s7 }
   0x9   :  { %p160_p3 = scmp.ne.s32.totalorder %s14_s7, %s159_s15  ;;  %p165_p5 = scmp.lt.s32.totalorder %s159_s15, %s159_s15 }
   0xb   :  { %p166_p6 = por %p165_p5, %p164_p4 }
   0xd   :  { %p167_p7 = pnand %p166_p6, %p160_p3 }
   0xf   :  { %170 = shalt.err (!%p167_p7)
}
  0x10   :  { %s198_s16 = smov 128   ;;  %s199_s17 = smov 8  }
  0x11   :  { %19 = dma.hbm_to_vmem [thread:$0]  %s247_s0, 1024, %s14_s7, [#allocation3], %s198_s16, %s198_s16, %s199_s17  }
  0x12   :  { %193 = dma.done.wait [#allocation3], 1024  }
  0x13   :  { %194 = vsyncadd [#allocation3], 4294966272  ;;  %v43_v0 = vld [vmem:[#allocation2 + $0x10] sm:$0xff]  ;;  %v29_v1 = vld [vmem:[#allocation2 + $0x8] sm:$0xff]  ;;  %vm25_vm0 = vcmask 130048   ;;  %s200_s20 = smov 32  }
  0x14   :  { %47 = vrot.lane.b32.xlu1 %v43_v0, %s200_s20  ;;  %s201_s21 = smov 16   ;;  %v44_v2 = vld [vmem:[#allocation2 + $0x30] sm:$0xff]  ;;  %v30_v3 = vld [vmem:[#allocation2 + $0x28] sm:$0xff]  ;;  %v71_v4 = vld [vmem:[#allocation2 + $0x20] sm:$0xff]  ;;  %s202_s0 = smov 48   ;;  %vm39_vm1 = vcmask 261248  }
  0x15   :  { %33 = vrot.lane.b32.xlu0 %v29_v1, %s201_s21  ;;  %v70_v5 = vld [vmem:[#allocation2] sm:$0xff]  ;;  %27 = vst.msk [vmem:[#allocation5 + $0x8] sm:$0xff] %vm25_vm0, %v71_v4  ;;  %v58_v6 = vld [vmem:[#allocation2 + $0x38] sm:$0xff]  ;;  %s203_s22 = smov 64   ;;  %s204_s23 = smov 80   ;;  %vm53_vm2 = vcmask 392448  }
  0x16   :  { %26 = vst.msk [vmem:[#allocation5] sm:$0xff] %vm25_vm0, %v70_v5  ;;  %v57_v7 = vld [vmem:[#allocation2 + $0x18] sm:$0xff]  ;;  %s205_s24 = smov 96   ;;  %vm67_vm3 = vcmask 523648   ;;  %vm80_vm4 = vcmask 654848   ;;  %vm93_vm5 = vcmask 786048  }
  0x17   :  { %vm106_vm6 = vcmask 917248   ;;  %s206_s25 = smov [#allocation5]   ;;  %vm119_vm7 = vcmask 1048448  }
  0x18   :  { %49 = vrot.lane.b32.xlu1 %v44_v2, %s200_s20  ;;  %s127_s26 = sshll.u32 %s206_s25, 4  ;;  %s128_s26 = int_to_ptr.vmem [resolvable:$true] %s127_s26 }
  0x19   :  { %35 = vrot.lane.b32.xlu0 %v30_v3, %s201_s21  ;;  %s171_s27 = scalar_lea.vmem %s128_s26, 256  ;;  %p176_p9 = scmp.lt.s32.totalorder %s128_s26, %s128_s26 }
  0x1a   :  { %p172_p8 = scmp.ne.s32.totalorder %s128_s26, %s171_s27  ;;  %p177_p10 = scmp.lt.s32.totalorder %s171_s27, %s171_s27 }
  0x1c   :  { %63 = vrot.lane.b32.xlu1 %v58_v6, %s202_s0  ;;  %p178_p11 = por %p177_p10, %p176_p9 }
  0x1d   :  { %61 = vrot.lane.b32.xlu0 %v57_v7, %s202_s0 }
  0x1e   :  { %p179_p12 = pnand %p178_p11, %p172_p8 }
  0x20   :  { %76 = vrot.lane.b32.xlu1 %v71_v4, %s202_s0 }
  0x21   :  { %74 = vrot.lane.b32.xlu0 %v70_v5, %s202_s0 }
  0x24   :  { %89 = vrot.lane.b32.xlu1 %v30_v3, %s203_s22 }
  0x25   :  { %87 = vrot.lane.b32.xlu0 %v29_v1, %s203_s22 }
  0x28   :  { %102 = vrot.lane.b32.xlu1 %v44_v2, %s204_s23 }
  0x29   :  { %100 = vrot.lane.b32.xlu0 %v43_v0, %s204_s23 }
  0x2c   :  { %115 = vrot.lane.b32.xlu1 %v58_v6, %s205_s24 }
  0x2d   :  { %113 = vrot.lane.b32.xlu0 %v57_v7, %s205_s24 }
  0x86   :  { %v48_v8 = vpop.permute.xlu1 %47 }
  0x87   :  { %v34_v9 = vpop.permute.xlu0 %33 }
  0x88   :  { %40 = vst.msk [vmem:[#allocation5] sm:$0xff] %vm39_vm1, %v34_v9 }
  0x89   :  { %54 = vst.msk [vmem:[#allocation5] sm:$0xff] %vm53_vm2, %v48_v8 }
  0x8a   :  { %v50_v10 = vpop.permute.xlu1 %49 }
  0x8b   :  { %v36_v11 = vpop.permute.xlu0 %35 }
  0x8c   :  { %41 = vst.msk [vmem:[#allocation5 + $0x8] sm:$0xff] %vm39_vm1, %v36_v11 }
  0x8d   :  { %55 = vst.msk [vmem:[#allocation5 + $0x8] sm:$0xff] %vm53_vm2, %v50_v10 }
  0x8e   :  { %v64_v12 = vpop.permute.xlu1 %63 }
  0x8f   :  { %v62_v13 = vpop.permute.xlu0 %61  ;;  %69 = vst.msk [vmem:[#allocation5 + $0x8] sm:$0xff] %vm67_vm3, %v64_v12 }
  0x90   :  { %68 = vst.msk [vmem:[#allocation5] sm:$0xff] %vm67_vm3, %v62_v13 }
  0x92   :  { %v77_v14 = vpop.permute.xlu1 %76 }
  0x93   :  { %v75_v15 = vpop.permute.xlu0 %74  ;;  %82 = vst.msk [vmem:[#allocation5 + $0x8] sm:$0xff] %vm80_vm4, %v77_v14 }
  0x94   :  { %81 = vst.msk [vmem:[#allocation5] sm:$0xff] %vm80_vm4, %v75_v15 }
  0x96   :  { %v90_v16 = vpop.permute.xlu1 %89 }
  0x97   :  { %v88_v17 = vpop.permute.xlu0 %87  ;;  %95 = vst.msk [vmem:[#allocation5 + $0x8] sm:$0xff] %vm93_vm5, %v90_v16 }
  0x98   :  { %94 = vst.msk [vmem:[#allocation5] sm:$0xff] %vm93_vm5, %v88_v17 }
  0x9a   :  { %v103_v18 = vpop.permute.xlu1 %102 }
  0x9b   :  { %v101_v19 = vpop.permute.xlu0 %100  ;;  %108 = vst.msk [vmem:[#allocation5 + $0x8] sm:$0xff] %vm106_vm6, %v103_v18 }
  0x9c   :  { %107 = vst.msk [vmem:[#allocation5] sm:$0xff] %vm106_vm6, %v101_v19 }
  0x9e   :  { %v116_v20 = vpop.permute.xlu1 %115 }
  0x9f   :  { %v114_v21 = vpop.permute.xlu0 %113  ;;  %121 = vst.msk [vmem:[#allocation5 + $0x8] sm:$0xff] %vm119_vm7, %v116_v20 }
  0xa0   :  { %120 = vst.msk [vmem:[#allocation5] sm:$0xff] %vm119_vm7, %v114_v21 }
  0xa1   :  { %182 = shalt.err (!%p179_p12)
}
  0xa2   :  { %s183_s30 = scalar_lea.hbm %s248_s1, 256 }
  0xa3   :  { %p184_p13 = scmp.ne.s32.totalorder %s248_s1, %s183_s30  ;;  %p187_p0 = scmp.lt.u32.totalorder %s183_s30, %s248_s1 }
  0xa5   :  { %p189_p1 = pnand %p187_p0, %p184_p13 }
  0xa7   :  { %192 = shalt.err (!%p189_p1)
}
  0xa8   :  { %133 = dma.vmem_to_hbm [thread:$0]  %s128_s26, 256, %s248_s1, [#allocation4], %s198_s16, %s198_s16, %s199_s17  }
  0xa9   :  { %195 = dma.done.wait [#allocation4], 256  }
  0xaa   :  { %196 = vsyncadd [#allocation4], 4294967040 }
  0xab   :  { %137 = vsyncpa [#allocation3], 1 }
  0xac   :  { %138 = vsyncpa [#allocation4], 1 }

</bundles_post_ra>
